<compile_context>
chip_gen: v6e
topology: v6e:2x2x1
jax: 0.10.0
libtpu: 0.0.40
codegen_flags: <defaults>
</compile_context>

<pallas_src>
import jax
import jax.numpy as jnp
from jax.experimental import pallas as pl
from jax.experimental.pallas import tpu as pltpu


def _round_up(x, m):
    return (x + m - 1) // m * m


def _round_down(x, m):
    return x // m * m


def _wce_kernel(logits_ref, tw_ref, out_ref):
    # logits_ref: (C, TL) caller dtype
    # tw_ref    : (2, TL) f32  -- row 0: anchor weight, row 1: target class index
    # out_ref   : (1, TL) f32
    x = logits_ref[...].astype(jnp.float32)                          # (C, TL)
    w = tw_ref[0:1, :]                                               # (1, TL) f32
    t = tw_ref[1:2, :].astype(jnp.int32)                             # (1, TL) exact ints

    row = jax.lax.broadcasted_iota(jnp.int32, x.shape, dimension=0)  # (C, TL)

    # stable logsumexp over classes (sublane axis)
    m = jnp.max(x, axis=0, keepdims=True)                            # (1, TL)
    lse = m + jnp.log(jnp.sum(jnp.exp(x - m), axis=0, keepdims=True))

    # gather logit at the target class via a masked sublane-sum
    picked = jnp.sum(jnp.where(row == t, x, 0.0), axis=0, keepdims=True)

    out_ref[...] = ((lse - picked) * w).astype(out_ref.dtype)        # (1, TL)


def weighted_cross_entropy_loss(logits, target, weights, *, target_idx=None,
                                vmem_budget_bytes=24 << 20):
    """Pallas forward of WeightedCrossEntropyLoss.

    logits, target: (B, A, C); weights: (B, A).  Returns (B, A) float32.
    If `target_idx` (B, A) integer class indices are provided, `target` one-hot is
    ignored (saves a full read of the (B, A, C) target array).
    """
    B, A, C = logits.shape
    R = B * A
    Cp = _round_up(max(C, 8), 8)  # sublane-padded class count (VMEM accounting)

    # ---- lane-tile selection -------------------------------------------------
    # VMEM per grid step ~= 2 double-buffered logits blocks (<= 4*Cp*TL bytes each)
    #                      + ~3 f32 temporaries of the same size
    #                      + 2 double-buffered 8-sublane-padded blocks (tw + out)
    #                     ~= TL * (20*Cp + 128) bytes.
    per_lane = 20 * Cp + 128
    tl_cap = max(128, _round_down(vmem_budget_bytes // per_lane, 128))
    # Keep >= ~8 blocks on big problems (megacore / v7x dual TC), but never shrink a
    # block below ~32K lanes just to split (the ~0.35us/step overhead would dominate).
    tl_split = max(32 * 1024, _round_up(pl.cdiv(R, 8), 128))
    tl = max(128, min(tl_cap, tl_split, _round_up(R, 128)))
    grid = (pl.cdiv(R, tl),)

    # ---- side inputs: pack [weights ; target class index] into one (2, R) f32 ----
    if target_idx is None:
        target_idx = jnp.argmax(target, axis=-1)          # one-hot -> index, read once
    idx_row = target_idx.reshape(1, R).astype(jnp.float32)  # exact for idx < 2^24
    w_row = weights.reshape(1, R).astype(jnp.float32)
    tw = jnp.concatenate([w_row, idx_row], axis=0)           # (2, R)

    # ---- logits: classes-on-sublanes / anchors-on-lanes -----------------------
    # TODO(synk): this transpose is the single remaining extra HBM pass over logits.
    logits_t = jnp.transpose(logits.reshape(R, C))           # (C, R), dtype preserved

    cost = pl.CostEstimate(
        flops=6 * R * C,
        transcendentals=R * C + R,
        bytes_accessed=R * C * logits.dtype.itemsize + 3 * R * 4,
    )

    out = pl.pallas_call(
        _wce_kernel,
        out_shape=jax.ShapeDtypeStruct((1, R), jnp.float32),
        grid_spec=pltpu.PrefetchScalarGridSpec(
            num_scalar_prefetch=0,
            grid=grid,
            in_specs=[
                pl.BlockSpec((C, tl), lambda i: (0, i)),
                pl.BlockSpec((2, tl), lambda i: (0, i)),
            ],
            out_specs=pl.BlockSpec((1, tl), lambda i: (0, i)),
        ),
        compiler_params=pltpu.CompilerParams(
            dimension_semantics=("parallel",),
            vmem_limit_bytes=48 << 20,
        ),
        cost_estimate=cost,
    )(logits_t, tw)

    return out[0, :R].reshape(B, A)


def _reference(logits, target, weights):
    # pure-JAX reference of the PyTorch forward
    tgt = jnp.argmax(target, axis=-1)
    logp = jax.nn.log_softmax(logits, axis=-1)
    nll = -jnp.take_along_axis(logp, tgt[..., None], axis=-1)[..., 0]
    return nll * weights


if __name__ == "__main__":
    B, A, C = 2, 16, 8
    key = jax.random.PRNGKey(0)
    k1, k2, k3 = jax.random.split(key, 3)

    logits = jax.random.normal(k1, (B, A, C), dtype=jnp.float32)
    cls = jax.random.randint(k2, (B, A), 0, C)
    target = jax.nn.one_hot(cls, C, dtype=jnp.float32)
    weights = jax.random.uniform(k3, (B, A), dtype=jnp.float32)

    loss = weighted_cross_entropy_loss(logits, target, weights)
    jax.block_until_ready(loss)

    ref = _reference(logits, target, weights)
    assert loss.shape == (B, A)
    assert jnp.allclose(loss, ref, atol=1e-5, rtol=1e-5), "mismatch vs reference"
    print("KERNEL_OK")
</pallas_src>

<mosaic_0001>
module attributes {stable_mosaic.version = 11 : i64} {
  func.func @_wce_kernel(%arg0: i32, %arg1: memref<8x128xf32, #tpu.memory_space<vmem>>, %arg2: memref<2x128xf32, #tpu.memory_space<vmem>>, %arg3: memref<1x128xf32, #tpu.memory_space<vmem>>) attributes {dimension_semantics = [#tpu.dimension_semantics<parallel>], iteration_bounds = array<i64: 1>, scalar_prefetch = 0 : i64, scratch_operands = 0 : i64, tpu.core_type = #tpu.core_type<tc>, window_params = [{transform_indices = @transform_0, window_bounds = array<i64: 8, 128>}, {transform_indices = @transform_1, window_bounds = array<i64: 2, 128>}, {transform_indices = @transform_2, window_bounds = array<i64: 1, 128>}]} {
    %c0 = arith.constant 0 : index
    %c0_0 = arith.constant 0 : index
    %0 = vector.load %arg1[%c0, %c0_0] : memref<8x128xf32, #tpu.memory_space<vmem>>, vector<8x128xf32>
    %c0_1 = arith.constant 0 : index
    %c0_2 = arith.constant 0 : index
    %1 = vector.load %arg2[%c0_1, %c0_2] : memref<2x128xf32, #tpu.memory_space<vmem>>, vector<1x128xf32>
    %c1 = arith.constant 1 : index
    %c0_3 = arith.constant 0 : index
    %2 = vector.load %arg2[%c1, %c0_3] : memref<2x128xf32, #tpu.memory_space<vmem>>, vector<1x128xf32>
    %3 = arith.fptosi %2 : vector<1x128xf32> to vector<1x128xi32>
    %4 = tpu.iota {dimensions = array<i32: 0>} : vector<8x128xi32>
    %cst = arith.constant dense<0xFF800000> : vector<128xf32>
    %5 = vector.multi_reduction <maximumf>, %0, %cst [0] : vector<8x128xf32> to vector<128xf32>
    %6 = vector.shape_cast %5 : vector<128xf32> to vector<1x128xf32>
    %7 = vector.broadcast %6 : vector<1x128xf32> to vector<8x128xf32>
    %8 = arith.subf %0, %7 : vector<8x128xf32>
    %9 = math.exp %8 : vector<8x128xf32>
    %cst_4 = arith.constant dense<0.000000e+00> : vector<128xf32>
    %10 = vector.multi_reduction <add>, %9, %cst_4 [0] : vector<8x128xf32> to vector<128xf32>
    %11 = vector.shape_cast %10 : vector<128xf32> to vector<1x128xf32>
    %12 = math.log %11 : vector<1x128xf32>
    %13 = arith.addf %6, %12 : vector<1x128xf32>
    %14 = vector.broadcast %3 : vector<1x128xi32> to vector<8x128xi32>
    %15 = arith.cmpi eq, %4, %14 : vector<8x128xi32>
    %cst_5 = arith.constant 0.000000e+00 : f32
    %16 = vector.broadcast %cst_5 : f32 to vector<8x128xf32>
    %17 = arith.select %15, %0, %16 : vector<8x128xi1>, vector<8x128xf32>
    %cst_6 = arith.constant dense<0.000000e+00> : vector<128xf32>
    %18 = vector.multi_reduction <add>, %17, %cst_6 [0] : vector<8x128xf32> to vector<128xf32>
    %19 = vector.shape_cast %18 : vector<128xf32> to vector<1x128xf32>
    %20 = arith.subf %13, %19 : vector<1x128xf32>
    %21 = arith.mulf %20, %1 : vector<1x128xf32>
    %c0_7 = arith.constant 0 : index
    %c0_8 = arith.constant 0 : index
    %22 = vector.load %arg3[%c0_7, %c0_8] : memref<1x128xf32, #tpu.memory_space<vmem>>, vector<1x128xf32>
    tpu.vector_store %arg3[%c0_7, %c0_8], %21 {strides = array<i32>} : memref<1x128xf32, #tpu.memory_space<vmem>>, vector<1x128xf32>,
    return
  }
  func.func @transform_0(%arg0: i32) -> (i32, i32) {
    %c0_i32 = arith.constant 0 : i32
    %c0_i32_0 = arith.constant 0 : i32
    return %c0_i32, %arg0 : i32, i32
  }
  func.func @transform_1(%arg0: i32) -> (i32, i32) {
    %c0_i32 = arith.constant 0 : i32
    %c0_i32_0 = arith.constant 0 : i32
    return %c0_i32, %arg0 : i32, i32
  }
  func.func @transform_2(%arg0: i32) -> (i32, i32) {
    %c0_i32 = arith.constant 0 : i32
    %c0_i32_0 = arith.constant 0 : i32
    return %c0_i32, %arg0 : i32, i32
  }
}

</mosaic_0001>

<bundles_post_ra>
// kernel: tpu_custom_call.1
= control target key start
LH: loop header
LB: loop body
LE: loop exit
PB: predicated region body
PF: predicated region fallthrough
CT: control target
= control target key end

     0   :  { %7 = vsyncpa [#allocation3], 0  ;;  %s193_s0 = inlined_call_operand.hbm [shape: f32[8,32], index: 0, kind: input, shape index: {}]   ;;  %s194_s1 = inlined_call_operand.hbm [shape: f32[2,32], index: 1, kind: input, shape index: {}]   ;;  %s195_s2 = inlined_call_operand.hbm [shape: f32[1,32], index: 2, kind: output, shape index: {}]  }
   0x1   :  { %8 = vsyncpa [#allocation6], 0 }
   0x2   :  { %9 = vsyncpa [#allocation4], 0  ;;  %s166_s9 = smov [#allocation2]   ;;  %s167_s11 = smov [#allocation5]  }
   0x3   :  { %s16_s10 = sshll.u32 %s166_s9, 4  ;;  %s26_s12 = sshll.u32 %s167_s11, 4  ;;  %s17_s10 = int_to_ptr.vmem [resolvable:$true] %s16_s10  ;;  %s27_s12 = int_to_ptr.vmem [resolvable:$true] %s26_s12 }
   0x4   :  { %s108_s13 = scalar_lea.vmem %s17_s10, 128  ;;  %p113_p1 = scmp.lt.s32.totalorder %s17_s10, %s17_s10 }
   0x5   :  { %p109_p0 = scmp.ne.s32.totalorder %s17_s10, %s108_s13  ;;  %p114_p2 = scmp.lt.s32.totalorder %s108_s13, %s108_s13 }
   0x7   :  { %p115_p3 = por %p114_p2, %p113_p1 }
   0x9   :  { %p116_p4 = pnand %p115_p3, %p109_p0 }
   0xb   :  { %119 = shalt.err (!%p116_p4)
}
   0xc   :  { %19 = dma.hbm_to_vmem [thread:$0]  %s193_s0, 128, %s17_s10, [#allocation3]  }
   0xd   :  { %s128_s16 = scalar_lea.vmem %s27_s12, 32  ;;  %p133_p6 = scmp.lt.s32.totalorder %s27_s12, %s27_s12 }
   0xe   :  { %p129_p5 = scmp.ne.s32.totalorder %s27_s12, %s128_s16  ;;  %p134_p7 = scmp.lt.s32.totalorder %s128_s16, %s128_s16 }
  0x10   :  { %p135_p8 = por %p134_p7, %p133_p6 }
  0x12   :  { %p136_p9 = pnand %p135_p8, %p129_p5 }
  0x14   :  { %139 = shalt.err (!%p136_p9)
}
  0x15   :  { %29 = dma.hbm_to_vmem [thread:$0]  %s194_s1, 32, %s27_s12, [#allocation6]  }
  0x16   :  { %160 = dma.done.wait [#allocation3], 128  }
  0x17   :  { %161 = vsyncadd [#allocation3], 4294967168 }
  0x18   :  { %162 = dma.done.wait [#allocation6], 32  }
  0x19   :  { %163 = vsyncadd [#allocation6], 4294967264  ;;  %v36_v0 = vld [vmem:[#allocation2] sm:$0xff]  ;;  %v40_v8 = vlaneseq  ;;  %v38_v10 = vld [vmem:[#allocation5 + $0x1] sm:$0x1]  ;;  %s168_s0 = smov [#allocation7]  }
  0x1a   :  { %v42_v1 = vrot.slane %v36_v0, 4  ;;  %v91_v11 = vtrunc.f32 %v38_v10  ;;  %v37_v33 = vld [vmem:[#allocation5] sm:$0x1]  ;;  %s81_s1 = sshll.u32 %s168_s0, 4  ;;  %s82_s1 = int_to_ptr.vmem [resolvable:$true] %s81_s1 }
  0x1b   :  { %v41_v12 = vshrl.u32 %v40_v8, 7  ;;  %s140_s19 = scalar_lea.vmem %s82_s1, 16  ;;  %s144_s20 = scalar_lea.vmem %s82_s1, 32 }
  0x1c   :  { %v43_v2 = vmax.f32 %v36_v0, %v42_v1  ;;  %v92_v13 = vcvt.f32.s32 %v91_v11  ;;  %p141_p10 = scmp.ne.s32.totalorder %s82_s1, %s140_s19  ;;  %p145_p11 = scmp.lt.s32.totalorder %s82_s1, %s82_s1 }
  0x1d   :  { %v62_v14 = vsub.s32 0, %v41_v12  ;;  %p146_p12 = scmp.lt.s32.totalorder %s144_s20, %s140_s19 }
  0x1e   :  { %v44_v3 = vrot.slane %v43_v2, 2 }
  0x1f   :  { %v63_v15 = vrot.slane %v92_v13, %v62_v14  ;;  %p147_p13 = por %p146_p12, %p145_p11 }
  0x20   :  { %v45_v4 = vmax.f32 %v43_v2, %v44_v3 }
  0x21   :  { %vm64_vm0 = vcmp.eq.s32.totalorder %v41_v12, %v63_v15  ;;  %p148_p0 = pnand %p147_p13, %p141_p10 }
  0x22   :  { %v46_v5 = vrot.slane %v45_v4, 1  ;;  %v65_v19 = vsel %vm64_vm0, %v36_v0, 0.0 }
  0x23   :  { %v66_v22 = vrot.slane %v65_v19, 4 }
  0x24   :  { %v47_v6 = vmax.f32 %v45_v4, %v46_v5 }
  0x25   :  { %v67_v25 = vadd.f32 %v66_v22, %v65_v19 }
  0x26   :  { %v48_v7 = vsub.f32 %v36_v0, %v47_v6 }
  0x27   :  { %v68_v26 = vrot.slane %v67_v25, 2 }
  0x28   :  { %v49_v9 = vmul.f32 1.442695, %v48_v7 }
  0x29   :  { %v69_v27 = vadd.f32 %v68_v26, %v67_v25 }
  0x2a   :  { %96 = vpow2.f32 %v49_v9 }
  0x2b   :  { %v70_v28 = vrot.slane %v69_v27, 1 }
  0x2d   :  { %v71_v31 = vadd.f32 %v70_v28, %v69_v27 }
  0x37   :  { %v97_v16 = vpop.eup %96 }
  0x38   :  { %v51_v17 = vrot.slane %v97_v16, 4 }
  0x3a   :  { %v52_v18 = vadd.f32 %v97_v16, %v51_v17 }
  0x3c   :  { %v53_v20 = vrot.slane %v52_v18, 2 }
  0x3e   :  { %v54_v21 = vadd.f32 %v53_v20, %v52_v18 }
  0x40   :  { %v55_v23 = vrot.slane %v54_v21, 1 }
  0x42   :  { %v56_v24 = vadd.f32 %v55_v23, %v54_v21 }
  0x44   :  { %98 = vlog2.f32 %v56_v24 }
  0x51   :  { %v99_v29 = vpop.eup %98 }
  0x52   :  { %v58_v30 = vmul.f32 0.6931472, %v99_v29 }
  0x54   :  { %v59_v32 = vadd.f32 %v58_v30, %v47_v6 }
  0x56   :  { %v72_v34 = vsub.f32 %v59_v32, %v71_v31 }
  0x58   :  { %v73_v35 = vmul.f32 %v72_v34, %v37_v33 }
  0x5a   :  { %74 = vst [vmem:[#allocation7] sm:$0x1] %v73_v35 }
  0x5b   :  { %151 = shalt.err (!%p148_p0)
}
  0x5c   :  { %84 = dma.vmem_to_hbm [thread:$0]  %s82_s1, 16, %s195_s2, [#allocation4]  }
  0x5d   :  { %164 = dma.done.wait [#allocation4], 16  }
  0x5e   :  { %165 = vsyncadd [#allocation4], 4294967280 }
  0x5f   :  { %88 = vsyncpa [#allocation3], 1 }
  0x60   :  { %89 = vsyncpa [#allocation6], 1 }
  0x61   :  { %90 = vsyncpa [#allocation4], 1 }

</bundles_post_ra>
